<compile_context>
chip_gen: v6e
topology: v6e:2x2x1
jax: 0.10.0
libtpu: 0.0.40
codegen_flags: <defaults>
</compile_context>

<pallas_src>
import functools

import jax
import jax.numpy as jnp
import numpy as np
from jax.experimental import pallas as pl
from jax.experimental.pallas import tpu as pltpu


def _round_up(x, m):
    return (x + m - 1) // m * m


# ----------------------------------------------------------------------------
# Pallas kernels
# ----------------------------------------------------------------------------
def _mm_bn_kernel(apply_relu, has_res, *refs):
    """Tiled bf16 matmul (f32 acc) + fused BN scale/shift (+residual) (+ReLU)."""
    if has_res:
        x_ref, w_ref, s_ref, b_ref, r_ref, o_ref, acc_ref = refs
    else:
        x_ref, w_ref, s_ref, b_ref, o_ref, acc_ref = refs

    @pl.when(pl.program_id(2) == 0)
    def _():
        acc_ref[...] = jnp.zeros_like(acc_ref)

    acc_ref[...] += jnp.dot(x_ref[...], w_ref[...],
                            preferred_element_type=jnp.float32)

    @pl.when(pl.program_id(2) == pl.num_programs(2) - 1)
    def _():
        y = acc_ref[...] * s_ref[...] + b_ref[...]
        if has_res:
            y = y + r_ref[...].astype(jnp.float32)
        if apply_relu:
            y = jnp.maximum(y, 0.0)
        o_ref[...] = y.astype(o_ref.dtype)


def _maxpool_kernel(x_ref, o_ref):
    # x_ref: (9, TM, C) — 9 shifted window taps; reduce over the tap axis.
    o_ref[...] = jnp.max(x_ref[...], axis=0)


def _avgpool_kernel(x_ref, o_ref):
    # x_ref: (N, H*W, C) — global average pool over the spatial axis (f32 acc).
    o_ref[...] = jnp.mean(x_ref[...].astype(jnp.float32), axis=1).astype(o_ref.dtype)


# ----------------------------------------------------------------------------
# Pallas wrappers
# ----------------------------------------------------------------------------
def matmul_bn(x, wp, sp, bp, n_logical, apply_relu=True, residual=None,
              out_dtype=jnp.bfloat16):
    """(M, K) @ pre-padded (Kp, Np) bf16 weight, fused scale/shift/res/relu."""
    M, K = x.shape
    Kp, Np = wp.shape

    TM = min(512, _round_up(M, 16))          # adaptive: no 128-pad for tiny M
    Mp = _round_up(M, TM)
    TN = 256 if Np % 256 == 0 else 128
    TK = 256 if Kp % 256 == 0 else 128

    xb = x.astype(jnp.bfloat16)
    if (Mp, Kp) != (M, K):
        xp = jnp.zeros((Mp, Kp), jnp.bfloat16).at[:M, :K].set(xb)
    else:
        xp = xb

    inputs = [xp, wp, sp, bp]
    in_specs = [
        pl.BlockSpec((TM, TK), lambda i, j, k: (i, k)),
        pl.BlockSpec((TK, TN), lambda i, j, k: (k, j)),
        pl.BlockSpec((1, TN), lambda i, j, k: (0, j)),
        pl.BlockSpec((1, TN), lambda i, j, k: (0, j)),
    ]
    has_res = residual is not None
    if has_res:
        rb = residual.astype(jnp.bfloat16)
        Mr, Nr = rb.shape
        if (Mp, Np) != (Mr, Nr):
            rp = jnp.zeros((Mp, Np), jnp.bfloat16).at[:Mr, :Nr].set(rb)
        else:
            rp = rb
        inputs.append(rp)
        in_specs.append(pl.BlockSpec((TM, TN), lambda i, j, k: (i, j)))

    kernel = functools.partial(_mm_bn_kernel, apply_relu, has_res)
    out = pl.pallas_call(
        kernel,
        out_shape=jax.ShapeDtypeStruct((Mp, Np), out_dtype),
        grid_spec=pltpu.PrefetchScalarGridSpec(
            num_scalar_prefetch=0,
            grid=(Mp // TM, Np // TN, Kp // TK),
            in_specs=in_specs,
            out_specs=pl.BlockSpec((TM, TN), lambda i, j, k: (i, j)),
            scratch_shapes=[pltpu.VMEM((TM, TN), jnp.float32)],
        ),
        compiler_params=pltpu.CompilerParams(
            dimension_semantics=("parallel", "parallel", "arbitrary")),
    )(*inputs)
    if (Mp, Np) != (M, n_logical):
        out = out[:M, :n_logical]
    return out


def maxpool_3x3_s2_p1(x):
    """MaxPool2d(kernel=3, stride=2, padding=1) on NHWC input."""
    N, H, W, C = x.shape
    neg = float(jnp.finfo(x.dtype).min)
    xp = jnp.pad(x, ((0, 0), (1, 1), (1, 1), (0, 0)), constant_values=neg)
    Ho = (H + 2 - 3) // 2 + 1
    Wo = (W + 2 - 3) // 2 + 1
    taps = []
    for i in range(3):
        for j in range(3):
            taps.append(xp[:, i:i + 2 * (Ho - 1) + 1:2,
                           j:j + 2 * (Wo - 1) + 1:2, :])
    M = N * Ho * Wo
    stacked = jnp.stack(taps, axis=0).reshape(9, M, C)

    TM = min(512, _round_up(M, 16))
    Mp = _round_up(M, TM)
    if Mp != M:
        stacked = jnp.pad(stacked, ((0, 0), (0, Mp - M), (0, 0)),
                          constant_values=neg)

    out = pl.pallas_call(
        _maxpool_kernel,
        out_shape=jax.ShapeDtypeStruct((Mp, C), x.dtype),
        grid=(Mp // TM,),
        in_specs=[pl.BlockSpec((9, TM, C), lambda m: (0, m, 0))],
        out_specs=pl.BlockSpec((TM, C), lambda m: (m, 0)),
        compiler_params=pltpu.CompilerParams(
            dimension_semantics=("parallel",)),
    )(stacked)
    return out[:M].reshape(N, Ho, Wo, C)


def global_avg_pool(x):
    """F.adaptive_avg_pool2d(x, 1) + flatten, on NHWC input -> (N, C)."""
    N, H, W, C = x.shape
    xr = x.reshape(N, H * W, C)
    return pl.pallas_call(
        _avgpool_kernel,
        out_shape=jax.ShapeDtypeStruct((N, C), x.dtype),
        grid=(1,),
        in_specs=[pl.BlockSpec((N, H * W, C), lambda i: (0, 0, 0))],
        out_specs=pl.BlockSpec((N, C), lambda i: (0, 0)),
    )(xr)


# ----------------------------------------------------------------------------
# Conv-as-im2col glue (pure JAX slicing; matmul hot path is in the kernel)
# ----------------------------------------------------------------------------
def im2col(x, kh, kw, stride, pad):
    """NHWC -> (N*Ho*Wo, kh*kw*C) patches, row layout (kh, kw, C)."""
    N, H, W, C = x.shape
    if pad > 0:
        x = jnp.pad(x, ((0, 0), (pad, pad), (pad, pad), (0, 0)))
    Hp, Wp = H + 2 * pad, W + 2 * pad
    Ho = (Hp - kh) // stride + 1
    Wo = (Wp - kw) // stride + 1
    cols = []
    for i in range(kh):
        for j in range(kw):
            cols.append(x[:, i:i + stride * (Ho - 1) + 1:stride,
                          j:j + stride * (Wo - 1) + 1:stride, :])
    patches = cols[0] if len(cols) == 1 else jnp.concatenate(cols, axis=-1)
    return patches.reshape(N * Ho * Wo, kh * kw * C), Ho, Wo


def conv_bn_apply(x, p, stride, pad, relu=True, residual=None):
    """Conv2d(bias=False) + BatchNorm2d (+ residual) (+ ReLU) on NHWC input."""
    N = x.shape[0]
    cols, Ho, Wo = im2col(x, p['kh'], p['kw'], stride, pad)
    cout = p['cout']
    res2d = None if residual is None else residual.reshape(N * Ho * Wo, cout)
    y = matmul_bn(cols, p['w'], p['scale'], p['shift'], cout,
                  apply_relu=relu, residual=res2d)
    return y.reshape(N, Ho, Wo, cout)


def linear_bn_apply(x, p, relu=True, out_dtype=jnp.bfloat16):
    """Linear (+ folded BatchNorm1d) (+ ReLU)."""
    return matmul_bn(x, p['w'], p['scale'], p['shift'], p['cout'],
                     apply_relu=relu, out_dtype=out_dtype)


# ----------------------------------------------------------------------------
# Deterministic synthetic parameters (mirrors nn.Module __init__ shapes)
# ----------------------------------------------------------------------------
class KeyGen:
    def __init__(self, seed):
        self.key = jax.random.PRNGKey(seed)

    def __call__(self):
        self.key, sub = jax.random.split(self.key)
        return sub


def _fold_bn(kg, cout, bias=None):
    gamma = jax.random.uniform(kg(), (cout,), minval=0.5, maxval=1.5)
    beta = jax.random.uniform(kg(), (cout,), minval=-0.1, maxval=0.1)
    mean = jax.random.uniform(kg(), (cout,), minval=-0.1, maxval=0.1)
    var = jax.random.uniform(kg(), (cout,), minval=0.5, maxval=1.5)
    eps = 1e-5  # PyTorch BatchNorm default
    scale = gamma / jnp.sqrt(var + eps)
    if bias is None:
        shift = beta - mean * scale
    else:
        shift = scale * (bias - mean) + beta
    return scale, shift


def _pack_wsb(w, scale, shift):
    """Pre-pad weight/scale/shift once to 128-multiples; weight stored bf16."""
    K, N = w.shape
    Kp, Np = _round_up(K, 128), _round_up(N, 128)
    wp = jnp.zeros((Kp, Np), jnp.bfloat16).at[:K, :N].set(w.astype(jnp.bfloat16))
    sp = jnp.zeros((1, Np), jnp.float32).at[0, :N].set(scale.astype(jnp.float32))
    bp = jnp.zeros((1, Np), jnp.float32).at[0, :N].set(shift.astype(jnp.float32))
    return wp, sp, bp


def make_convbn(kg, kh, kw, cin, cout):
    fan_in = kh * kw * cin
    w = jax.random.normal(kg(), (fan_in, cout), jnp.float32) * np.sqrt(2.0 / fan_in)
    scale, shift = _fold_bn(kg, cout)
    wp, sp, bp = _pack_wsb(w, scale, shift)
    return {'w': wp, 'scale': sp, 'shift': bp, 'kh': kh, 'kw': kw, 'cout': cout}


def make_linear(kg, cin, cout, with_bn=True):
    bound = 1.0 / np.sqrt(cin)
    w = jax.random.uniform(kg(), (cin, cout), jnp.float32, -bound, bound)
    b = jax.random.uniform(kg(), (cout,), jnp.float32, -bound, bound)
    if with_bn:
        scale, shift = _fold_bn(kg, cout, bias=b)
    else:
        scale = jnp.ones((cout,), jnp.float32)
        shift = b
    wp, sp, bp = _pack_wsb(w, scale, shift)
    return {'w': wp, 'scale': sp, 'shift': bp, 'cout': cout}


def make_basic_block(kg, cin, outs):
    return {
        'c1': make_convbn(kg, 1, 1, cin, outs[0]),
        'c2': make_convbn(kg, 3, 3, outs[0], outs[1]),
        'c3': make_convbn(kg, 1, 1, outs[1], outs[2]),
    }


def make_down_block(kg, cin, outs):
    return {
        'c1': make_convbn(kg, 1, 1, cin, outs[0]),
        'c2': make_convbn(kg, 3, 3, outs[0], outs[1]),
        'c3': make_convbn(kg, 1, 1, outs[1], outs[2]),
        'cd': make_convbn(kg, 1, 1, cin, outs[2]),
    }


def make_resnet50_params(kg, start_channels):
    p = {'stem': make_convbn(kg, 7, 7, start_channels, 64)}
    p['stage1'] = ([make_down_block(kg, 64, [64, 64, 256])] +
                   [make_basic_block(kg, 256, [64, 64, 256]) for _ in range(2)])
    p['stage2'] = ([make_down_block(kg, 256, [128, 128, 512])] +
                   [make_basic_block(kg, 512, [128, 128, 512]) for _ in range(3)])
    p['stage3'] = ([make_down_block(kg, 512, [256, 256, 1024])] +
                   [make_basic_block(kg, 1024, [256, 256, 1024]) for _ in range(5)])
    p['stage4'] = ([make_down_block(kg, 1024, [512, 512, 2048])] +
                   [make_basic_block(kg, 2048, [512, 512, 2048]) for _ in range(2)])
    return p


def make_ori_branch_params(seed, start_channels=3):
    kg = KeyGen(seed)
    return {
        'resnet': make_resnet50_params(kg, start_channels),
        'gender': make_linear(kg, 1, 32, with_bn=True),
        'fc1': make_linear(kg, 2048 + 32, 1024, with_bn=True),
        'fc2': make_linear(kg, 1024, 512, with_bn=True),
        'fc3': make_linear(kg, 512, 230, with_bn=False),
    }


# ----------------------------------------------------------------------------
# Forward pass
# ----------------------------------------------------------------------------
def basic_block_apply(x, p):
    out = conv_bn_apply(x, p['c1'], stride=1, pad=0, relu=True)
    out = conv_bn_apply(out, p['c2'], stride=1, pad=1, relu=True)
    out = conv_bn_apply(out, p['c3'], stride=1, pad=0, relu=True, residual=x)
    return out


def down_block_apply(x, p, s):
    shortcut = conv_bn_apply(x, p['cd'], stride=s, pad=0, relu=False)
    out = conv_bn_apply(x, p['c1'], stride=1, pad=0, relu=True)
    out = conv_bn_apply(out, p['c2'], stride=s, pad=1, relu=True)
    out = conv_bn_apply(out, p['c3'], stride=1, pad=0, relu=True,
                        residual=shortcut)
    return out


def resnet50_forward(params, x_nchw):
    # NCHW (PyTorch) -> NHWC internal, bf16 activations end-to-end.
    x = jnp.transpose(x_nchw, (0, 2, 3, 1)).astype(jnp.bfloat16)

    out = conv_bn_apply(x, params['stem'], stride=2, pad=3, relu=True)
    out = maxpool_3x3_s2_p1(out)

    stage_strides = {'stage1': 1, 'stage2': 2, 'stage3': 2, 'stage4': 2}
    feats = []
    for name in ('stage1', 'stage2', 'stage3', 'stage4'):
        blocks = params[name]
        out = down_block_apply(out, blocks[0], stage_strides[name])
        for bp in blocks[1:]:
            out = basic_block_apply(out, bp)
        feats.append(out)

    fea = global_avg_pool(out)          # (N, 2048) bf16
    return feats, fea


def ori_branch_forward(params, ori_nchw, gender):
    """oriBranchNet.forward(ori, gender) -> (N, 230) logits."""
    _, fea = resnet50_forward(params['resnet'], ori_nchw)
    g = linear_bn_apply(gender.astype(jnp.bfloat16), params['gender'], relu=True)
    h = jnp.concatenate([fea, g], axis=-1)          # (N, 2080)
    h = linear_bn_apply(h, params['fc1'], relu=True)
    h = linear_bn_apply(h, params['fc2'], relu=True)
    logits = linear_bn_apply(h, params['fc3'], relu=False, out_dtype=jnp.float32)
    return logits


# ----------------------------------------------------------------------------
if __name__ == "__main__":
    params = make_ori_branch_params(0, start_channels=3)

    k1, k2 = jax.random.split(jax.random.PRNGKey(0))
    ori = jax.random.normal(k1, (2, 3, 64, 64), jnp.float32)
    gender = jax.random.bernoulli(k2, 0.5, (2, 1)).astype(jnp.float32)

    logits = ori_branch_forward(params, ori, gender)
    logits = jax.block_until_ready(logits)

    assert logits.shape == (2, 230)
    assert bool(jnp.all(jnp.isfinite(logits)))
    print("KERNEL_OK")
</pallas_src>

<mosaic_0001>
module attributes {stable_mosaic.version = 11 : i64} {
  func.func @_mm_bn_kernel(%arg0: i32, %arg1: i32, %arg2: i32, %arg3: memref<512x256xbf16, #tpu.memory_space<vmem>>, %arg4: memref<256x128xbf16, #tpu.memory_space<vmem>>, %arg5: memref<1x128xf32, #tpu.memory_space<vmem>>, %arg6: memref<1x128xf32, #tpu.memory_space<vmem>>, %arg7: memref<512x128xbf16, #tpu.memory_space<vmem>>, %arg8: memref<512x128xf32, #tpu.memory_space<vmem>>) attributes {dimension_semantics = [#tpu.dimension_semantics<parallel>, #tpu.dimension_semantics<parallel>, #tpu.dimension_semantics<arbitrary>], iteration_bounds = array<i64: 4, 1, 1>, scalar_prefetch = 0 : i64, scratch_operands = 1 : i64, tpu.core_type = #tpu.core_type<tc>, window_params = [{transform_indices = @transform_0, window_bounds = array<i64: 512, 256>}, {transform_indices = @transform_1, window_bounds = array<i64: 256, 128>}, {transform_indices = @transform_2, window_bounds = array<i64: 1, 128>}, {transform_indices = @transform_3, window_bounds = array<i64: 1, 128>}, {transform_indices = @transform_4, window_bounds = array<i64: 512, 128>}]} {
    %c0_i32 = arith.constant 0 : i32
    %0 = arith.cmpi eq, %arg2, %c0_i32 : i32
    %1 = arith.extui %0 : i1 to i32
    %c0_i32_0 = arith.constant 0 : i32
    %2 = arith.cmpi ne, %1, %c0_i32_0 : i32
    scf.if %2 {
      %cst_10 = arith.constant 0.000000e+00 : f32
      %12 = vector.broadcast %cst_10 : f32 to vector<512x128xf32>
      %c0_11 = arith.constant 0 : index
      %c0_12 = arith.constant 0 : index
      %13 = vector.load %arg8[%c0_11, %c0_12] : memref<512x128xf32, #tpu.memory_space<vmem>>, vector<512x128xf32>
      tpu.vector_store %arg8[%c0_11, %c0_12], %12 {strides = array<i32>} : memref<512x128xf32, #tpu.memory_space<vmem>>, vector<512x128xf32>,
    } else {
    }
    %c0 = arith.constant 0 : index
    %c0_1 = arith.constant 0 : index
    %3 = vector.load %arg8[%c0, %c0_1] : memref<512x128xf32, #tpu.memory_space<vmem>>, vector<512x128xf32>
    %c0_2 = arith.constant 0 : index
    %c0_3 = arith.constant 0 : index
    %4 = vector.load %arg3[%c0_2, %c0_3] : memref<512x256xbf16, #tpu.memory_space<vmem>>, vector<512x256xbf16>
    %c0_4 = arith.constant 0 : index
    %c0_5 = arith.constant 0 : index
    %5 = vector.load %arg4[%c0_4, %c0_5] : memref<256x128xbf16, #tpu.memory_space<vmem>>, vector<256x128xbf16>
    %cst = arith.constant dense<0.000000e+00> : vector<512x128xf32>
    %6 = tpu.matmul %4, %5, %cst {dimension_numbers = #tpu.dot_dimension_numbers<[1], [0], [0], [1], [0, 0, 1, 1], [], []>} : vector<512x256xbf16>, vector<256x128xbf16>, vector<512x128xf32> -> vector<512x128xf32>
    %7 = arith.addf %3, %6 : vector<512x128xf32>
    %c0_6 = arith.constant 0 : index
    %c0_7 = arith.constant 0 : index
    %8 = vector.load %arg8[%c0_6, %c0_7] : memref<512x128xf32, #tpu.memory_space<vmem>>, vector<512x128xf32>
    tpu.vector_store %arg8[%c0_6, %c0_7], %7 {strides = array<i32>} : memref<512x128xf32, #tpu.memory_space<vmem>>, vector<512x128xf32>,
    %c0_i32_8 = arith.constant 0 : i32
    %9 = arith.cmpi eq, %arg2, %c0_i32_8 : i32
    %10 = arith.extui %9 : i1 to i32
    %c0_i32_9 = arith.constant 0 : i32
    %11 = arith.cmpi ne, %10, %c0_i32_9 : i32
    scf.if %11 {
      %c0_10 = arith.constant 0 : index
      %c0_11 = arith.constant 0 : index
      %12 = vector.load %arg8[%c0_10, %c0_11] : memref<512x128xf32, #tpu.memory_space<vmem>>, vector<512x128xf32>
      %c0_12 = arith.constant 0 : index
      %c0_13 = arith.constant 0 : index
      %13 = vector.load %arg5[%c0_12, %c0_13] : memref<1x128xf32, #tpu.memory_space<vmem>>, vector<1x128xf32>
      %14 = vector.broadcast %13 : vector<1x128xf32> to vector<512x128xf32>
      %15 = arith.mulf %12, %14 : vector<512x128xf32>
      %c0_14 = arith.constant 0 : index
      %c0_15 = arith.constant 0 : index
      %16 = vector.load %arg6[%c0_14, %c0_15] : memref<1x128xf32, #tpu.memory_space<vmem>>, vector<1x128xf32>
      %17 = vector.broadcast %16 : vector<1x128xf32> to vector<512x128xf32>
      %18 = arith.addf %15, %17 : vector<512x128xf32>
      %cst_16 = arith.constant 0.000000e+00 : f32
      %19 = vector.broadcast %cst_16 : f32 to vector<512x128xf32>
      %20 = arith.maximumf %18, %19 : vector<512x128xf32>
      %21 = arith.truncf %20 : vector<512x128xf32> to vector<512x128xbf16>
      %c0_17 = arith.constant 0 : index
      %c0_18 = arith.constant 0 : index
      %22 = vector.load %arg7[%c0_17, %c0_18] : memref<512x128xbf16, #tpu.memory_space<vmem>>, vector<512x128xbf16>
      tpu.vector_store %arg7[%c0_17, %c0_18], %21 {strides = array<i32>} : memref<512x128xbf16, #tpu.memory_space<vmem>>, vector<512x128xbf16>,
    } else {
    }
    return
  }
  func.func @transform_0(%arg0: i32, %arg1: i32, %arg2: i32) -> (i32, i32) {
    %c0_i32 = arith.constant 0 : i32
    return %arg0, %arg2 : i32, i32
  }
  func.func @transform_1(%arg0: i32, %arg1: i32, %arg2: i32) -> (i32, i32) {
    %c0_i32 = arith.constant 0 : i32
    return %arg2, %arg1 : i32, i32
  }
  func.func @transform_2(%arg0: i32, %arg1: i32, %arg2: i32) -> (i32, i32) {
    %c0_i32 = arith.constant 0 : i32
    %c0_i32_0 = arith.constant 0 : i32
    return %c0_i32, %arg1 : i32, i32
  }
  func.func @transform_3(%arg0: i32, %arg1: i32, %arg2: i32) -> (i32, i32) {
    %c0_i32 = arith.constant 0 : i32
    %c0_i32_0 = arith.constant 0 : i32
    return %c0_i32, %arg1 : i32, i32
  }
  func.func @transform_4(%arg0: i32, %arg1: i32, %arg2: i32) -> (i32, i32) {
    %c0_i32 = arith.constant 0 : i32
    return %arg0, %arg1 : i32, i32
  }
}

</mosaic_0001>

<bundles_post_ra>
// kernel: tpu_custom_call.1
= control target key start
LH: loop header
LB: loop body
LE: loop exit
PB: predicated region body
PF: predicated region fallthrough
CT: control target
= control target key end

     0   :  { %s3371_s0 = inlined_call_operand.hbm [shape: bf16[2048,256], index: 0, kind: input, shape index: {}]   ;;  %s3372_s1 = inlined_call_operand.hbm [shape: bf16[256,128], index: 1, kind: input, shape index: {}]   ;;  %s3373_s2 = inlined_call_operand.vmem [shape: f32[1,128], index: 2, kind: input, shape index: {}]   ;;  %s3374_s3 = inlined_call_operand.vmem [shape: f32[1,128], index: 3, kind: input, shape index: {}]   ;;  %s3375_s4 = inlined_call_operand.hbm [shape: bf16[2048,128], index: 4, kind: output, shape index: {}]  }
   0x1   :  { %3377 = sst [smem:[#allocation12_spill]] %s3372_s1 }
   0x2   :  { %9 = vsyncpa [#allocation4], 0 }
   0x3   :  { %11 = vsyncpa [#allocation4 + $0x1], 0 }
   0x4   :  { %12 = vsyncpa [#allocation7], 0 }
   0x5   :  { %13 = vsyncpa [#allocation5], 0 }
   0x6   :  { %15 = vsyncpa [#allocation5 + $0x1], 0  ;;  %s2920_s15 = smov 0   ;;  %s2922_s16 = smov 0  }
   0x7   :  { %s2924_s17 = smov 0   ;;  %s2926_s18 = smov 0  }
   0x8   :  { %s2928_s19 = smov 0   ;;  %s2930_s20 = smov 0  }
   0x9 LB: > { %s2097_s21 = sadd.s32 4294967295, %s2883_s20   ;;  %s2098_s22 = sadd.s32 4294967294, %s2883_s20   ;;  %s2883_s20 = sphi %s2930_s20, %s21_s20   ;;  %s2879_s19 = sphi %s2928_s19, %s3394_s19   ;;  %s2875_s18 = sphi %s2926_s18, %s3393_s18   ;;  %s2871_s17 = sphi %s2924_s17, %s3392_s17   ;;  %s2867_s16 = sphi %s2922_s16, %s3391_s16   ;;  %s2863_s15 = sphi %s2920_s15, %s3390_s15  }
   0xa   : > { %p62_p0 = scmp.ne.s32.totalorder %s2867_s16, %s2863_s15  ;;  %p2954_p1 = scmp.eq.s32.totalorder %s2097_s21, 0 }
   0xb   : > { %p2958_p2 = scmp.eq.s32.totalorder %s2097_s21, 3  ;;  %p174_p3 = scmp.eq.s32.totalorder %s2098_s22, 3 }
   0xc   : > { %p2964_p4 = por %p2954_p1, %p62_p0  ;;  %p2099_p5 = scmp.ge.s32.totalorder %s2883_s20, 1 }
   0xd   : > { %p2969_p6 = por %p174_p3, %p62_p0  ;;  %p181_p7 = scmp.lt.s32.totalorder %s2883_s20, 5 }
   0xe   : > { %s2885_s28 = smov [#allocation6]   ;;  %s40_s5 = sadd.s32 1, %s2879_s19 }
   0xf   : > { %s3381_s26 = scalar_select %p2969_p6, 1, 0 }
  0x10   : > { %p2974_p8 = pnand %p2099_p5, %p181_p7  ;;  %s197_s29 = sshll.u32 %s2885_s28, 4  ;;  %s198_s29 = int_to_ptr.vmem [resolvable:$true] %s197_s29 }
  0x11   : > { %s2756_s6 = scalar_lea.vmem %s198_s29, 2048  ;;  %p2764_p3 = scmp.lt.s32.totalorder %s198_s29, %s198_s29 }
  0x12   : > { %p2561_p9 = pneg %p2974_p8  ;;  %p2757_p12 = scmp.ne.s32.totalorder %s198_s29, %s2756_s6 }
  0x13   : > { %p2765_p5 = scmp.lt.s32.totalorder %s2756_s6, %s2756_s6 }
  0x14   : > { %p2982_p10 = pnand %p2561_p9, %p2954_p1 }
  0x15   : > { %p2766_p7 = por %p2765_p5, %p2764_p3 }
  0x16   : > { %p2747_p11 = pneg %p2982_p10 }
  0x18   : > { %p2759_p13 = pnand %p2757_p12, %p2747_p11 }
  0x1a   : > { %p2760_p0 = pneg %p2759_p13 }
  0x1c   : > { %p2767_p6 = pnand %p2766_p7, %p2760_p0 }
  0x1e   : > { %2770 = shalt.err (!%p2767_p6)
}
  0x1f   : > { %s2886_s7 = smov 64   ;;  %s2887_s8 = smov 4  }
  0x20   : > { %s3384_s1 = sld [smem:[#allocation12_spill]]  ;;  %p42_p9 = scmp.ge.s32.totalorder %s40_s5, 4 }
  0x21   : > { %s49_s11 = sadd.s32 1, %s2871_s17  ;;  %p56_p6 = scmp.ne.s32.totalorder %s2871_s17, %s2867_s16 }
  0x22   : > { %p57_p11 = scmp.eq.s32.totalorder %s2883_s20, 0  ;;  %s3396_s5 = smov (%p42_p9, %s40_s5), 0 }
  0x23   : > { %p3006_p13 = por %p2958_p2, %p56_p6  ;;  %s44_s14 = ssub.s32 %s2879_s19, %s3396_s5 }
  0x24   : > { %p3000_p12 = por %p57_p11, %p56_p6  ;;  %p2574_p0 = scmp.lt.s32.totalorder %s2883_s20, 4 }
  0x25   : > { %s3386_s13 = scalar_select %p3006_p13, 1, 0 }
  0x26   : > { %2564 = dma.hbm_to_vmem [thread:$0]  (!%p2982_p10), %s3384_s1, 2048, %s198_s29, [#allocation7], %s2886_s7, %s2886_s7, %s2887_s8  }
  0x27   : > { %p47_p10 = scmp.eq.s32.totalorder %s44_s14, 0  ;;  %s223_s21 = sand.u32 1, %s2871_s17  }
  0x28   : > { %s2104_s22 = sshll.u32 %s223_s21, 9  ;;  %s2264_s29 = sshll.u32 %s2879_s19, 13 }
  0x29   : > { %s3015_s28 = scalar_select %p47_p10, %s2871_s17, %s49_s11  }
  0x2a   : > { %s236_s7 = scalar_lea.hbm %s3371_s0, %s2264_s29  ;;  %s227_s8 = scalar_lea.vmem [#allocation3], %s2104_s22 }
  0x2b   : > { %s237_s9 = sshll.u32 %s227_s8, 4  ;;  %p3023_p2 = pnand %p2574_p0, %p3000_p12  ;;  %s238_s9 = int_to_ptr.vmem [resolvable:$true] %s237_s9 }
  0x2c   : > { %s224_s10 = scalar_lea.sflag [#allocation4], %s223_s21  ;;  %s2784_s14 = scalar_lea.vmem %s238_s9, 8192 }
  0x2d   : > { %p2773_p3 = pneg %p3023_p2  ;;  %p2785_p5 = scmp.ne.s32.totalorder %s238_s9, %s2784_s14 }
  0x2e   : > { %s2888_s11 = smov [#allocation3]  }
  0x2f   : > { %p2787_p7 = pnand %p2785_p5, %p2773_p3  ;;  %s2789_s1 = sshll.u32 %s2888_s11, 4  ;;  %s2790_s1 = int_to_ptr.vmem [resolvable:$false] %s2789_s1 }
  0x30   : > { %s2791_s29 = scalar_lea.vmem %s2790_s1, 16384  ;;  %p2792_p6 = scmp.lt.s32.totalorder %s238_s9, %s2790_s1 }
  0x31   : > { %p2788_p9 = pneg %p2787_p7  ;;  %p2793_p11 = scmp.lt.s32.totalorder %s2791_s29, %s2784_s14 }
  0x33   : > { %p2794_p10 = por %p2793_p11, %p2792_p6 }
  0x35   : > { %p2795_p13 = pnand %p2794_p10, %p2788_p9 }
  0x37   : > { %2798 = shalt.err (!%p2795_p13)
}
  0x38   : > { %s2889_s12 = smov 128   ;;  %s2890_s22 = smov 8  }
  0x39   : > { %2568 = dma.hbm_to_vmem [thread:$0]  (!%p3023_p2), %s236_s7, 8192, %s238_s9, %s224_s10, %s2889_s12, %s2889_s12, %s2890_s22  }
  0x3a   : > { %249 = sbr.rel (%p2974_p8) target bundleno = 470 (0x1d6), region = 36  ;;  %s3034_s21 = sand.u32 (!%p2974_p8), 1, %s2867_s16  }
  0x3b   : > { %s2109_s30 = sshll.u32 (!%p2974_p8), %s3034_s21, 9  ;;  %s252_s1 = scalar_lea.sflag (!%p2974_p8), [#allocation4], %s3034_s21 }
  0x3c   : > { %s3038_s6 = scalar_lea.vmem (!%p2974_p8), [#allocation3], %s2109_s30 }
  0x3f   : > { %2850 = dma.done.wait (%p2964_p4), %s252_s1, 8192  }
  0x40   : > { %2852 = vsyncadd (%p2964_p4), %s252_s1, 4294959104 }
  0x41   : > { %2854 = dma.done.wait (%p2954_p1), [#allocation7], 2048  }
  0x42   : > { %2856 = vsyncadd (%p2954_p1), [#allocation7], 4294965248  ;;  %v2891_v0 = vmov 0   ;;  %v2633_v1 = vld [vmem:[#allocation6 + $0x38] sm:$0xff]   ;;  %v2634_v2 = vld [vmem:[#allocation6 + $0x30] sm:$0xff]   ;;  %s2111_s8 = sshll.u32 %s3034_s21, 8 }
  0x43   : > { %945 = vmatprep.subr.bf16.mxu0 %v2891_v0  ;;  %2521 = vmatprep.subr.bf16.mxu1 %v2891_v0  ;;  %v2635_v3 = vld [vmem:[#allocation6 + $0x28] sm:$0xff]   ;;  %v2636_v4 = vld [vmem:[#allocation6 + $0x20] sm:$0xff]   ;;  %v2637_v5 = vld [vmem:[#allocation6 + $0x18] sm:$0xff]   ;;  %s3167_s9 = scalar_lea.vmem [#allocation8], %s2111_s8  ;;  %s2329_s24 = sshll.u32 %s2875_s18, 12 }
  0x44   : > { %946 = vmatpush1.bf16.msra.mxu0 %v2633_v1  ;;  %2537 = vmatpush1.bf16.msra.mxu1 %v2633_v1  ;;  %v2651_v6 = vld [vmem:[%s3038_s6 + $0x4] ss:$8 sps:$4 sm:$0xff]   ;;  %v2638_v7 = vld [vmem:[#allocation6 + $0x10] sm:$0xff]   ;;  %v2641_v11 = vld [vmem:[#allocation6 + $0x78] sm:$0xff]   ;;  %s1970_s10 = sshll.u32 %s3167_s9, 4  ;;  %s3320_s29 = scalar_lea.hbm %s3375_s4, %s2329_s24  ;;  %s3322_s10 = int_to_ptr.vmem [resolvable:$true] %s1970_s10 }
  0x45   : > { %947 = vmatprep.subr.bf16.mxu0 %v2891_v0  ;;  %2522 = vmatprep.subr.bf16.mxu1 %v2891_v0  ;;  %v2654_v8 = vld [vmem:[%s3038_s6 + $0x104] ss:$8 sps:$4 sm:$0xff]   ;;  %v2642_v12 = vld [vmem:[#allocation6 + $0x70] sm:$0xff]   ;;  %v2645_v15 = vld [vmem:[#allocation6 + $0x58] sm:$0xff]   ;;  %s1956_s18 = scalar_lea.sflag [#allocation5], %s3034_s21  ;;  %s2799_s12 = scalar_lea.vmem %s3322_s10, 4096 }
  0x46   : > { %977 = vmatprep.mubr.bf16.mxu0 %v2651_v6  ;;  %1105 = vmatprep.mubr.bf16.mxu1 %v2654_v8  ;;  %v2639_v9 = vld [vmem:[#allocation6 + $0x8] sm:$0xff]   ;;  %v2640_v10 = vld [vmem:[#allocation6] sm:$0xff]   ;;  %v2646_v16 = vld [vmem:[#allocation6 + $0x50] sm:$0xff]   ;;  %p2800_p1 = scmp.ne.s32.totalorder %s3322_s10, %s2799_s12  ;;  %p3388_p4 = scmp.ne.s32.totalorder %s3386_s13, 0 }
  0x47   : > { %v2643_v13 = vld [vmem:[#allocation6 + $0x68] sm:$0xff]   ;;  %v2644_v14 = vld [vmem:[#allocation6 + $0x60] sm:$0xff]   ;;  %v2655_v21 = vld [vmem:[%s3038_s6 + $0x14] ss:$8 sps:$4 sm:$0xff]   ;;  %s2892_s22 = smov [#allocation8]  }
  0x48   : > { %948 = vmatpush1.bf16.msra.mxu0 %v2634_v2  ;;  %2538 = vmatpush1.bf16.msra.mxu1 %v2634_v2  ;;  %v2647_v17 = vld [vmem:[#allocation6 + $0x48] sm:$0xff]   ;;  %v2648_v18 = vld [vmem:[#allocation6 + $0x40] sm:$0xff]   ;;  %v2657_v22 = vld [vmem:[%s3038_s6 + $0x114] ss:$8 sps:$4 sm:$0xff]   ;;  %p2801_p8 = pnand %p2800_p1, %p3388_p4  ;;  %s2803_s30 = sshll.u32 %s2892_s22, 4  ;;  %s2804_s30 = int_to_ptr.vmem [resolvable:$false] %s2803_s30 }
  0x49   : > { %949 = vmatprep.subr.bf16.mxu0 %v2891_v0  ;;  %2523 = vmatprep.subr.bf16.mxu1 %v2891_v0  ;;  %v2649_v19 = vld [vmem:[%s3038_s6] ss:$8 sps:$4 sm:$0xff]   ;;  %v2659_v23 = vld [vmem:[%s3038_s6 + $0x10] ss:$8 sps:$4 sm:$0xff]   ;;  %v2661_v25 = vld [vmem:[%s3038_s6 + $0x24] ss:$8 sps:$4 sm:$0xff]   ;;  %p2806_p13 = scmp.lt.s32.totalorder %s3322_s10, %s2804_s30 }
  0x4a   : > { %v2652_v20 = vld [vmem:[%s3038_s6 + $0x100] ss:$8 sps:$4 sm:$0xff]   ;;  %v2660_v24 = vld [vmem:[%s3038_s6 + $0x110] ss:$8 sps:$4 sm:$0xff]   ;;  %v2663_v26 = vld [vmem:[%s3038_s6 + $0x124] ss:$8 sps:$4 sm:$0xff]   ;;  %p2802_p12 = pneg %p2801_p8 }
  0x4b   : > { %v2665_v27 = vld [vmem:[%s3038_s6 + $0x20] ss:$8 sps:$4 sm:$0xff]   ;;  %v2667_v29 = vld [vmem:[%s3038_s6 + $0x34] ss:$8 sps:$4 sm:$0xff]   ;;  %v2671_v31 = vld [vmem:[%s3038_s6 + $0x30] ss:$8 sps:$4 sm:$0xff]  }
  0x4c   : > { %950 = vmatpush1.bf16.msra.mxu0 %v2635_v3  ;;  %2539 = vmatpush1.bf16.msra.mxu1 %v2635_v3  ;;  %v2666_v28 = vld [vmem:[%s3038_s6 + $0x120] ss:$8 sps:$4 sm:$0xff]   ;;  %v2669_v30 = vld [vmem:[%s3038_s6 + $0x134] ss:$8 sps:$4 sm:$0xff]   ;;  %v2672_v32 = vld [vmem:[%s3038_s6 + $0x130] ss:$8 sps:$4 sm:$0xff]  }
  0x4d   : > { %951 = vmatprep.subr.bf16.mxu0 %v2891_v0  ;;  %2524 = vmatprep.subr.bf16.mxu1 %v2891_v0  ;;  %v2673_v33 = vld [vmem:[%s3038_s6 + $0x44] ss:$8 sps:$4 sm:$0xff]   ;;  %v2677_v35 = vld [vmem:[%s3038_s6 + $0x40] ss:$8 sps:$4 sm:$0xff]   ;;  %v2679_v37 = vld [vmem:[%s3038_s6 + $0x54] ss:$8 sps:$4 sm:$0xff]  }
  0x4e   : > { %v2675_v34 = vld [vmem:[%s3038_s6 + $0x144] ss:$8 sps:$4 sm:$0xff]   ;;  %v2678_v36 = vld [vmem:[%s3038_s6 + $0x140] ss:$8 sps:$4 sm:$0xff]   ;;  %v2681_v38 = vld [vmem:[%s3038_s6 + $0x154] ss:$8 sps:$4 sm:$0xff]  }
  0x4f   : > { %v2683_v39 = vld [vmem:[%s3038_s6 + $0x50] ss:$8 sps:$4 sm:$0xff]   ;;  %v2685_v41 = vld [vmem:[%s3038_s6 + $0x64] ss:$8 sps:$4 sm:$0xff]   ;;  %v2689_v43 = vld [vmem:[%s3038_s6 + $0x60] ss:$8 sps:$4 sm:$0xff]  }
  0x50   : > { %952 = vmatpush1.bf16.msra.mxu0 %v2636_v4  ;;  %2540 = vmatpush1.bf16.msra.mxu1 %v2636_v4  ;;  %v2684_v40 = vld [vmem:[%s3038_s6 + $0x150] ss:$8 sps:$4 sm:$0xff]   ;;  %v2687_v42 = vld [vmem:[%s3038_s6 + $0x164] ss:$8 sps:$4 sm:$0xff]   ;;  %v2690_v44 = vld [vmem:[%s3038_s6 + $0x160] ss:$8 sps:$4 sm:$0xff]  }
  0x51   : > { %953 = vmatprep.subr.bf16.mxu0 %v2891_v0  ;;  %2525 = vmatprep.subr.bf16.mxu1 %v2891_v0  ;;  %v2691_v45 = vld [vmem:[%s3038_s6 + $0x74] ss:$8 sps:$4 sm:$0xff]   ;;  %v2695_v47 = vld [vmem:[%s3038_s6 + $0x70] ss:$8 sps:$4 sm:$0xff]   ;;  %v2697_v49 = vld [vmem:[%s3038_s6 + $0x84] ss:$8 sps:$4 sm:$0xff]  }
  0x52   : > { %v2693_v46 = vld [vmem:[%s3038_s6 + $0x174] ss:$8 sps:$4 sm:$0xff]   ;;  %v2696_v48 = vld [vmem:[%s3038_s6 + $0x170] ss:$8 sps:$4 sm:$0xff]   ;;  %v2699_v50 = vld [vmem:[%s3038_s6 + $0x184] ss:$8 sps:$4 sm:$0xff]  }
  0x53   : > { %v2701_v51 = vld [vmem:[%s3038_s6 + $0x80] ss:$8 sps:$4 sm:$0xff]   ;;  %v2703_v53 = vld [vmem:[%s3038_s6 + $0x94] ss:$8 sps:$4 sm:$0xff]   ;;  %v2707_v55 = vld [vmem:[%s3038_s6 + $0x90] ss:$8 sps:$4 sm:$0xff]  }
  0x54   : > { %954 = vmatpush1.bf16.msra.mxu0 %v2637_v5  ;;  %2541 = vmatpush1.bf16.msra.mxu1 %v2637_v5  ;;  %v2702_v52 = vld [vmem:[%s3038_s6 + $0x180] ss:$8 sps:$4 sm:$0xff]   ;;  %v2705_v54 = vld [vmem:[%s3038_s6 + $0x194] ss:$8 sps:$4 sm:$0xff]   ;;  %v2708_v56 = vld [vmem:[%s3038_s6 + $0x190] ss:$8 sps:$4 sm:$0xff]  }
  0x55   : > { %955 = vmatprep.subr.bf16.mxu0 %v2891_v0  ;;  %2526 = vmatprep.subr.bf16.mxu1 %v2891_v0  ;;  %v2709_v57 = vld [vmem:[%s3038_s6 + $0xa4] ss:$8 sps:$4 sm:$0xff]   ;;  %v2713_v59 = vld [vmem:[%s3038_s6 + $0xa0] ss:$8 sps:$4 sm:$0xff]   ;;  %v2715_v61 = vld [vmem:[%s3038_s6 + $0xb4] ss:$8 sps:$4 sm:$0xff]  }
  0x56   : > { %v2711_v58 = vld [vmem:[%s3038_s6 + $0x1a4] ss:$8 sps:$4 sm:$0xff]   ;;  %v2714_v60 = vld [vmem:[%s3038_s6 + $0x1a0] ss:$8 sps:$4 sm:$0xff]   ;;  %v2717_v62 = vld [vmem:[%s3038_s6 + $0x1b4] ss:$8 sps:$4 sm:$0xff]  }
  0x57   : > { %v2719_v63 = vld [vmem:[%s3038_s6 + $0xb0] ss:$8 sps:$4 sm:$0xff]   ;;  %v2721_v1 = vld [vmem:[%s3038_s6 + $0xc4] ss:$8 sps:$4 sm:$0xff]   ;;  %v2725_v3 = vld [vmem:[%s3038_s6 + $0xc0] ss:$8 sps:$4 sm:$0xff]  }
  0x58   : > { %956 = vmatpush1.bf16.msra.mxu0 %v2638_v7  ;;  %2542 = vmatpush1.bf16.msra.mxu1 %v2638_v7  ;;  %v2723_v2 = vld [vmem:[%s3038_s6 + $0x1c4] ss:$8 sps:$4 sm:$0xff]   ;;  %v2726_v4 = vld [vmem:[%s3038_s6 + $0x1c0] ss:$8 sps:$4 sm:$0xff]   ;;  %v2727_v5 = vld [vmem:[%s3038_s6 + $0xd4] ss:$8 sps:$4 sm:$0xff]  }
  0x59   : > { %957 = vmatprep.subr.bf16.mxu0 %v2891_v0  ;;  %2527 = vmatprep.subr.bf16.mxu1 %v2891_v0  ;;  %v2729_v6 = vld [vmem:[%s3038_s6 + $0x1d4] ss:$8 sps:$4 sm:$0xff]   ;;  %v2731_v7 = vld [vmem:[%s3038_s6 + $0xd0] ss:$8 sps:$4 sm:$0xff]   ;;  %s2805_s1 = scalar_lea.vmem %s2804_s30, 8192 }
  0x5a   : > { %v2732_v8 = vld [vmem:[%s3038_s6 + $0x1d0] ss:$8 sps:$4 sm:$0xff]   ;;  %p2807_p0 = scmp.lt.s32.totalorder %s2805_s1, %s2799_s12 }
  0x5c   : > { %958 = vmatpush1.bf16.msra.mxu0 %v2639_v9  ;;  %2543 = vmatpush1.bf16.msra.mxu1 %v2639_v9  ;;  %v2733_v9 = vld [vmem:[%s3038_s6 + $0xe4] ss:$8 sps:$4 sm:$0xff]   ;;  %p2808_p2 = por %p2807_p0, %p2806_p13 }
  0x5d   : > { %959 = vmatprep.subr.bf16.mxu0 %v2891_v0  ;;  %2528 = vmatprep.subr.bf16.mxu1 %v2891_v0 }
  0x5e   : > { %p2809_p3 = pnand %p2808_p2, %p2802_p12 }
  0x60   : > { %960 = vmatpush1.bf16.msra.mxu0 %v2640_v10  ;;  %2544 = vmatpush1.bf16.msra.mxu1 %v2640_v10  ;;  %v2735_v10 = vld [vmem:[%s3038_s6 + $0x1e4] ss:$8 sps:$4 sm:$0xff]  }
  0x61   : > { %961 = vmatprep.subr.bf16.mxu0 %v2891_v0  ;;  %2529 = vmatprep.subr.bf16.mxu1 %v2891_v0 }
  0x64   : > { %962 = vmatpush2.bf16.msra.mxu0 %v2641_v11  ;;  %2545 = vmatpush2.bf16.msra.mxu1 %v2641_v11  ;;  %v2737_v11 = vld [vmem:[%s3038_s6 + $0xe0] ss:$8 sps:$4 sm:$0xff]  }
  0x65   : > { %963 = vmatprep.subr.bf16.mxu0 %v2891_v0  ;;  %2530 = vmatprep.subr.bf16.mxu1 %v2891_v0 }
  0x68   : > { %964 = vmatpush2.bf16.msra.mxu0 %v2642_v12  ;;  %2546 = vmatpush2.bf16.msra.mxu1 %v2642_v12  ;;  %v2738_v12 = vld [vmem:[%s3038_s6 + $0x1e0] ss:$8 sps:$4 sm:$0xff]  }
  0x69   : > { %965 = vmatprep.subr.bf16.mxu0 %v2891_v0  ;;  %2531 = vmatprep.subr.bf16.mxu1 %v2891_v0 }
  0x6c   : > { %966 = vmatpush2.bf16.msra.mxu0 %v2643_v13  ;;  %2547 = vmatpush2.bf16.msra.mxu1 %v2643_v13  ;;  %v2739_v13 = vld [vmem:[%s3038_s6 + $0xf4] ss:$8 sps:$4 sm:$0xff]  }
  0x6d   : > { %967 = vmatprep.subr.bf16.mxu0 %v2891_v0  ;;  %2532 = vmatprep.subr.bf16.mxu1 %v2891_v0 }
  0x70   : > { %968 = vmatpush2.bf16.msra.mxu0 %v2644_v14  ;;  %2548 = vmatpush2.bf16.msra.mxu1 %v2644_v14  ;;  %v2741_v14 = vld [vmem:[%s3038_s6 + $0x1f4] ss:$8 sps:$4 sm:$0xff]  }
  0x71   : > { %969 = vmatprep.subr.bf16.mxu0 %v2891_v0  ;;  %2533 = vmatprep.subr.bf16.mxu1 %v2891_v0 }
  0x74   : > { %970 = vmatpush2.bf16.msra.mxu0 %v2645_v15  ;;  %2549 = vmatpush2.bf16.msra.mxu1 %v2645_v15  ;;  %v2743_v15 = vld [vmem:[%s3038_s6 + $0xf0] ss:$8 sps:$4 sm:$0xff]  }
  0x75   : > { %971 = vmatprep.subr.bf16.mxu0 %v2891_v0  ;;  %2534 = vmatprep.subr.bf16.mxu1 %v2891_v0 }
  0x78   : > { %972 = vmatpush2.bf16.msra.mxu0 %v2646_v16  ;;  %2550 = vmatpush2.bf16.msra.mxu1 %v2646_v16  ;;  %v2744_v16 = vld [vmem:[%s3038_s6 + $0x1f0] ss:$8 sps:$4 sm:$0xff]  }
  0x79   : > { %973 = vmatprep.subr.bf16.mxu0 %v2891_v0  ;;  %2535 = vmatprep.subr.bf16.mxu1 %v2891_v0 }
  0x7c   : > { %974 = vmatpush2.bf16.msra.mxu0 %v2647_v17  ;;  %2551 = vmatpush2.bf16.msra.mxu1 %v2647_v17  ;;  %v3147_v17 = vld [vmem:[%s3373_s2] ss:$0 sm:$0xff] }
  0x7d   : > { %975 = vmatprep.subr.bf16.mxu0 %v2891_v0  ;;  %2536 = vmatprep.subr.bf16.mxu1 %v2891_v0  ;;  %v2720_v0 = vld [vmem:[%s3038_s6 + $0x1b0] ss:$8 sps:$4 sm:$0xff]  }
  0x80   : > { %976 = vmatpush2.bf16.msra.mxu0 %v2648_v18  ;;  %2552 = vmatpush2.bf16.msra.mxu1 %v2648_v18 }
  0x83   : > { %978 = vmatmul.mubr.bf16.vlgmr.msra.gmra.mxu0 %v2649_v19  ;;  %1106 = vmatmul.mubr.bf16.vlgmr.msra.gmra.mxu1 %v2652_v20 }
  0x84   : > { %985 = vmatprep.mubr.bf16.mxu0 %v2655_v21  ;;  %1113 = vmatprep.mubr.bf16.mxu1 %v2657_v22  ;;  %v3153_v21 = vld [vmem:[%s3374_s3] ss:$0 sm:$0xff] }
  0x8b   : > { %986 = vmatmul.mubr.bf16.gmra.mxu0 %v2659_v23  ;;  %1114 = vmatmul.mubr.bf16.gmra.mxu1 %v2660_v24 }
  0x8c   : > { %993 = vmatprep.mubr.bf16.mxu0 %v2661_v25  ;;  %1121 = vmatprep.mubr.bf16.mxu1 %v2663_v26 }
  0x93   : > { %994 = vmatmul.mubr.bf16.gmra.mxu0 %v2665_v27  ;;  %1122 = vmatmul.mubr.bf16.gmra.mxu1 %v2666_v28 }
  0x94   : > { %1001 = vmatprep.mubr.bf16.mxu0 %v2667_v29  ;;  %1129 = vmatprep.mubr.bf16.mxu1 %v2669_v30 }
  0x9b   : > { %1002 = vmatmul.mubr.bf16.gmra.mxu0 %v2671_v31  ;;  %1130 = vmatmul.mubr.bf16.gmra.mxu1 %v2672_v32 }
  0x9c   : > { %1009 = vmatprep.mubr.bf16.mxu0 %v2673_v33  ;;  %1137 = vmatprep.mubr.bf16.mxu1 %v2675_v34 }
  0xa3   : > { %1010 = vmatmul.mubr.bf16.gmra.mxu0 %v2677_v35  ;;  %1138 = vmatmul.mubr.bf16.gmra.mxu1 %v2678_v36 }
  0xa4   : > { %1017 = vmatprep.mubr.bf16.mxu0 %v2679_v37  ;;  %1145 = vmatprep.mubr.bf16.mxu1 %v2681_v38 }
  0xab   : > { %1018 = vmatmul.mubr.bf16.gmra.mxu0 %v2683_v39  ;;  %1146 = vmatmul.mubr.bf16.gmra.mxu1 %v2684_v40 }
  0xac   : > { %1025 = vmatprep.mubr.bf16.mxu0 %v2685_v41  ;;  %1153 = vmatprep.mubr.bf16.mxu1 %v2687_v42 }
  0xb3   : > { %1026 = vmatmul.mubr.bf16.gmra.mxu0 %v2689_v43  ;;  %1154 = vmatmul.mubr.bf16.gmra.mxu1 %v2690_v44 }
  0xb4   : > { %1033 = vmatprep.mubr.bf16.mxu0 %v2691_v45  ;;  %1161 = vmatprep.mubr.bf16.mxu1 %v2693_v46 }
  0xbb   : > { %1034 = vmatmul.mubr.bf16.gmra.mxu0 %v2695_v47  ;;  %1162 = vmatmul.mubr.bf16.gmra.mxu1 %v2696_v48 }
  0xbc   : > { %1041 = vmatprep.mubr.bf16.mxu0 %v2697_v49  ;;  %1169 = vmatprep.mubr.bf16.mxu1 %v2699_v50 }
  0xc3   : > { %1042 = vmatmul.mubr.bf16.gmra.mxu0 %v2701_v51  ;;  %1170 = vmatmul.mubr.bf16.gmra.mxu1 %v2702_v52 }
  0xc4   : > { %1049 = vmatprep.mubr.bf16.mxu0 %v2703_v53  ;;  %1177 = vmatprep.mubr.bf16.mxu1 %v2705_v54 }
  0xcb   : > { %1050 = vmatmul.mubr.bf16.gmra.mxu0 %v2707_v55  ;;  %1178 = vmatmul.mubr.bf16.gmra.mxu1 %v2708_v56 }
  0xcc   : > { %1057 = vmatprep.mubr.bf16.mxu0 %v2709_v57  ;;  %1185 = vmatprep.mubr.bf16.mxu1 %v2711_v58 }
  0xd3   : > { %1058 = vmatmul.mubr.bf16.gmra.mxu0 %v2713_v59  ;;  %1186 = vmatmul.mubr.bf16.gmra.mxu1 %v2714_v60 }
  0xd4   : > { %1065 = vmatprep.mubr.bf16.mxu0 %v2715_v61  ;;  %1193 = vmatprep.mubr.bf16.mxu1 %v2717_v62 }
  0xdb   : > { %1066 = vmatmul.mubr.bf16.gmra.mxu0 %v2719_v63  ;;  %1194 = vmatmul.mubr.bf16.gmra.mxu1 %v2720_v0 }
  0xdc   : > { %1073 = vmatprep.mubr.bf16.mxu0 %v2721_v1  ;;  %1201 = vmatprep.mubr.bf16.mxu1 %v2723_v2 }
  0xe3   : > { %1074 = vmatmul.mubr.bf16.gmra.mxu0 %v2725_v3  ;;  %1202 = vmatmul.mubr.bf16.gmra.mxu1 %v2726_v4 }
  0xe4   : > { %1081 = vmatprep.mubr.bf16.mxu0 %v2727_v5  ;;  %1209 = vmatprep.mubr.bf16.mxu1 %v2729_v6 }
  0xeb   : > { %1082 = vmatmul.mubr.bf16.gmra.mxu0 %v2731_v7  ;;  %1210 = vmatmul.mubr.bf16.gmra.mxu1 %v2732_v8 }
  0xec   : > { %1089 = vmatprep.mubr.bf16.mxu0 %v2733_v9  ;;  %1217 = vmatprep.mubr.bf16.mxu1 %v2735_v10 }
  0xf3   : > { %1090 = vmatmul.mubr.bf16.gmra.mxu0 %v2737_v11  ;;  %1218 = vmatmul.mubr.bf16.gmra.mxu1 %v2738_v12 }
  0xf4   : > { %1097 = vmatprep.mubr.bf16.mxu0 %v2739_v13  ;;  %1225 = vmatprep.mubr.bf16.mxu1 %v2741_v14 }
  0xfb   : > { %1098 = vmatmul.mubr.bf16.gmra.mxu0 %v2743_v15  ;;  %1226 = vmatmul.mubr.bf16.gmra.mxu1 %v2744_v16 }
 0x143   : > { %v979_v18 = vpop.f32.mrf.mxu0  ;;  %v1107_v19 = vpop.f32.mrf.mxu1 }
 0x144   : > { %v1436_v20 = vmul.f32 %v3147_v17, %v979_v18  ;;  %v1468_v22 = vmul.f32 %v3147_v17, %v1107_v19 }
 0x145   : > { %v981_v23 = vpop.f32.mrf.mxu0  ;;  %v1109_v24 = vpop.f32.mrf.mxu1 }
 0x146   : > { %v1507_v25 = vadd.f32 %v3153_v21, %v1436_v20  ;;  %v1539_v26 = vadd.f32 %v3153_v21, %v1468_v22 }
 0x147   : > { %v982_v27 = vpop.f32.mrf.mxu0  ;;  %v1110_v28 = vpop.f32.mrf.mxu1 }
 0x148   : > { %v1437_v29 = vmul.f32 %v3147_v17, %v982_v27  ;;  %v1469_v30 = vmul.f32 %v3147_v17, %v1110_v28  ;;  %v1571_v35 = vmax.f32 %v1507_v25, 0.0  ;;  %v1603_v36 = vmax.f32 %v1539_v26, 0.0 }
 0x149   : > { %v984_v31 = vpop.f32.mrf.mxu0  ;;  %v1112_v32 = vpop.f32.mrf.mxu1 }
 0x14a   : > { %v1508_v33 = vadd.f32 %v3153_v21, %v1437_v29  ;;  %v1540_v34 = vadd.f32 %v3153_v21, %v1469_v30 }
 0x14b   : > { %v987_v37 = vpop.f32.mrf.mxu0  ;;  %v1115_v38 = vpop.f32.mrf.mxu1 }
 0x14c   : > { %v1572_v39 = vmax.f32 %v1508_v33, 0.0  ;;  %v1604_v40 = vmax.f32 %v1540_v34, 0.0  ;;  %v1438_v41 = vmul.f32 %v3147_v17, %v987_v37  ;;  %v1470_v42 = vmul.f32 %v3147_v17, %v1115_v38 }
 0x14d   : > { %v989_v43 = vpop.f32.mrf.mxu0  ;;  %v1117_v44 = vpop.f32.mrf.mxu1 }
 0x14e   : > { %v2333_v45 = vpack.c.bf16 %v1572_v39, %v1571_v35  ;;  %v2413_v46 = vpack.c.bf16 %v1604_v40, %v1603_v36  ;;  %v1509_v47 = vadd.f32 %v3153_v21, %v1438_v41  ;;  %v1541_v48 = vadd.f32 %v3153_v21, %v1470_v42 }
 0x14f   : > { %v990_v49 = vpop.f32.mrf.mxu0  ;;  %v1118_v50 = vpop.f32.mrf.mxu1 }
 0x150   : > { %2334 = vst [vmem:[%s3167_s9] sm:$0xff] %v2333_v45   ;;  %2505 = vst [vmem:[%s3167_s9 + $0x80] sm:$0xff] %v2413_v46   ;;  %v1439_v51 = vmul.f32 %v3147_v17, %v990_v49  ;;  %v1471_v52 = vmul.f32 %v3147_v17, %v1118_v50  ;;  %v1573_v57 = vmax.f32 %v1509_v47, 0.0  ;;  %v1605_v58 = vmax.f32 %v1541_v48, 0.0 }
 0x151   : > { %v992_v53 = vpop.f32.mrf.mxu0  ;;  %v1120_v54 = vpop.f32.mrf.mxu1 }
 0x152   : > { %v1510_v55 = vadd.f32 %v3153_v21, %v1439_v51  ;;  %v1542_v56 = vadd.f32 %v3153_v21, %v1471_v52 }
 0x153   : > { %v995_v59 = vpop.f32.mrf.mxu0  ;;  %v1123_v60 = vpop.f32.mrf.mxu1 }
 0x154   : > { %v1574_v61 = vmax.f32 %v1510_v55, 0.0  ;;  %v1606_v62 = vmax.f32 %v1542_v56, 0.0  ;;  %v1440_v63 = vmul.f32 %v3147_v17, %v995_v59  ;;  %v1472_v0 = vmul.f32 %v3147_v17, %v1123_v60 }
 0x155   : > { %v997_v1 = vpop.f32.mrf.mxu0  ;;  %v1125_v2 = vpop.f32.mrf.mxu1 }
 0x156   : > { %v2338_v3 = vpack.c.bf16 %v1574_v61, %v1573_v57  ;;  %v2418_v4 = vpack.c.bf16 %v1606_v62, %v1605_v58  ;;  %v1511_v5 = vadd.f32 %v3153_v21, %v1440_v63  ;;  %v1543_v6 = vadd.f32 %v3153_v21, %v1472_v0 }
 0x157   : > { %v998_v7 = vpop.f32.mrf.mxu0  ;;  %v1126_v8 = vpop.f32.mrf.mxu1 }
 0x158   : > { %2490 = vst [vmem:[%s3167_s9 + $0x8] sm:$0xff] %v2338_v3   ;;  %2506 = vst [vmem:[%s3167_s9 + $0x88] sm:$0xff] %v2418_v4   ;;  %v1441_v9 = vmul.f32 %v3147_v17, %v998_v7  ;;  %v1473_v10 = vmul.f32 %v3147_v17, %v1126_v8  ;;  %v1575_v15 = vmax.f32 %v1511_v5, 0.0  ;;  %v1607_v16 = vmax.f32 %v1543_v6, 0.0 }
 0x159   : > { %v1000_v11 = vpop.f32.mrf.mxu0  ;;  %v1128_v12 = vpop.f32.mrf.mxu1 }
 0x15a   : > { %v1512_v13 = vadd.f32 %v3153_v21, %v1441_v9  ;;  %v1544_v14 = vadd.f32 %v3153_v21, %v1473_v10 }
 0x15b   : > { %v1003_v18 = vpop.f32.mrf.mxu0  ;;  %v1131_v19 = vpop.f32.mrf.mxu1 }
 0x15c   : > { %v1576_v20 = vmax.f32 %v1512_v13, 0.0  ;;  %v1608_v22 = vmax.f32 %v1544_v14, 0.0  ;;  %v1442_v23 = vmul.f32 %v3147_v17, %v1003_v18  ;;  %v1474_v24 = vmul.f32 %v3147_v17, %v1131_v19 }
 0x15d   : > { %v1005_v25 = vpop.f32.mrf.mxu0  ;;  %v1133_v26 = vpop.f32.mrf.mxu1 }
 0x15e   : > { %v2343_v27 = vpack.c.bf16 %v1576_v20, %v1575_v15  ;;  %v2423_v28 = vpack.c.bf16 %v1608_v22, %v1607_v16  ;;  %v1513_v29 = vadd.f32 %v3153_v21, %v1442_v23  ;;  %v1545_v30 = vadd.f32 %v3153_v21, %v1474_v24 }
 0x15f   : > { %v1006_v31 = vpop.f32.mrf.mxu0  ;;  %v1134_v32 = vpop.f32.mrf.mxu1 }
 0x160   : > { %2491 = vst [vmem:[%s3167_s9 + $0x10] sm:$0xff] %v2343_v27   ;;  %2507 = vst [vmem:[%s3167_s9 + $0x90] sm:$0xff] %v2423_v28   ;;  %v1443_v33 = vmul.f32 %v3147_v17, %v1006_v31  ;;  %v1475_v34 = vmul.f32 %v3147_v17, %v1134_v32  ;;  %v1577_v39 = vmax.f32 %v1513_v29, 0.0  ;;  %v1609_v40 = vmax.f32 %v1545_v30, 0.0 }
 0x161   : > { %v1008_v35 = vpop.f32.mrf.mxu0  ;;  %v1136_v36 = vpop.f32.mrf.mxu1 }
 0x162   : > { %v1514_v37 = vadd.f32 %v3153_v21, %v1443_v33  ;;  %v1546_v38 = vadd.f32 %v3153_v21, %v1475_v34 }
 0x163   : > { %v1011_v41 = vpop.f32.mrf.mxu0  ;;  %v1139_v42 = vpop.f32.mrf.mxu1 }
 0x164   : > { %v1578_v43 = vmax.f32 %v1514_v37, 0.0  ;;  %v1610_v44 = vmax.f32 %v1546_v38, 0.0  ;;  %v1444_v45 = vmul.f32 %v3147_v17, %v1011_v41  ;;  %v1476_v46 = vmul.f32 %v3147_v17, %v1139_v42 }
 0x165   : > { %v1013_v47 = vpop.f32.mrf.mxu0  ;;  %v1141_v48 = vpop.f32.mrf.mxu1 }
 0x166   : > { %v2348_v49 = vpack.c.bf16 %v1578_v43, %v1577_v39  ;;  %v2428_v50 = vpack.c.bf16 %v1610_v44, %v1609_v40  ;;  %v1515_v51 = vadd.f32 %v3153_v21, %v1444_v45  ;;  %v1547_v52 = vadd.f32 %v3153_v21, %v1476_v46 }
 0x167   : > { %v1014_v53 = vpop.f32.mrf.mxu0  ;;  %v1142_v54 = vpop.f32.mrf.mxu1 }
 0x168   : > { %2492 = vst [vmem:[%s3167_s9 + $0x18] sm:$0xff] %v2348_v49   ;;  %2508 = vst [vmem:[%s3167_s9 + $0x98] sm:$0xff] %v2428_v50   ;;  %v1445_v55 = vmul.f32 %v3147_v17, %v1014_v53  ;;  %v1477_v56 = vmul.f32 %v3147_v17, %v1142_v54  ;;  %v1579_v61 = vmax.f32 %v1515_v51, 0.0  ;;  %v1611_v62 = vmax.f32 %v1547_v52, 0.0 }
 0x169   : > { %v1016_v57 = vpop.f32.mrf.mxu0  ;;  %v1144_v58 = vpop.f32.mrf.mxu1 }
 0x16a   : > { %v1516_v59 = vadd.f32 %v3153_v21, %v1445_v55  ;;  %v1548_v60 = vadd.f32 %v3153_v21, %v1477_v56 }
 0x16b   : > { %v1019_v63 = vpop.f32.mrf.mxu0  ;;  %v1147_v0 = vpop.f32.mrf.mxu1 }
 0x16c   : > { %v1580_v1 = vmax.f32 %v1516_v59, 0.0  ;;  %v1612_v2 = vmax.f32 %v1548_v60, 0.0  ;;  %v1446_v3 = vmul.f32 %v3147_v17, %v1019_v63  ;;  %v1478_v4 = vmul.f32 %v3147_v17, %v1147_v0 }
 0x16d   : > { %v1021_v5 = vpop.f32.mrf.mxu0  ;;  %v1149_v6 = vpop.f32.mrf.mxu1 }
 0x16e   : > { %v2353_v7 = vpack.c.bf16 %v1580_v1, %v1579_v61  ;;  %v2433_v8 = vpack.c.bf16 %v1612_v2, %v1611_v62  ;;  %v1517_v9 = vadd.f32 %v3153_v21, %v1446_v3  ;;  %v1549_v10 = vadd.f32 %v3153_v21, %v1478_v4 }
 0x16f   : > { %v1022_v11 = vpop.f32.mrf.mxu0  ;;  %v1150_v12 = vpop.f32.mrf.mxu1 }
 0x170   : > { %2493 = vst [vmem:[%s3167_s9 + $0x20] sm:$0xff] %v2353_v7   ;;  %2509 = vst [vmem:[%s3167_s9 + $0xa0] sm:$0xff] %v2433_v8   ;;  %v1447_v13 = vmul.f32 %v3147_v17, %v1022_v11  ;;  %v1479_v14 = vmul.f32 %v3147_v17, %v1150_v12  ;;  %v1581_v20 = vmax.f32 %v1517_v9, 0.0  ;;  %v1613_v22 = vmax.f32 %v1549_v10, 0.0 }
 0x171   : > { %v1024_v15 = vpop.f32.mrf.mxu0  ;;  %v1152_v16 = vpop.f32.mrf.mxu1 }
 0x172   : > { %v1518_v18 = vadd.f32 %v3153_v21, %v1447_v13  ;;  %v1550_v19 = vadd.f32 %v3153_v21, %v1479_v14 }
 0x173   : > { %v1027_v23 = vpop.f32.mrf.mxu0  ;;  %v1155_v24 = vpop.f32.mrf.mxu1 }
 0x174   : > { %v1582_v25 = vmax.f32 %v1518_v18, 0.0  ;;  %v1614_v26 = vmax.f32 %v1550_v19, 0.0  ;;  %v1448_v27 = vmul.f32 %v3147_v17, %v1027_v23  ;;  %v1480_v28 = vmul.f32 %v3147_v17, %v1155_v24 }
 0x175   : > { %v1029_v29 = vpop.f32.mrf.mxu0  ;;  %v1157_v30 = vpop.f32.mrf.mxu1 }
 0x176   : > { %v2358_v31 = vpack.c.bf16 %v1582_v25, %v1581_v20  ;;  %v2438_v32 = vpack.c.bf16 %v1614_v26, %v1613_v22  ;;  %v1519_v33 = vadd.f32 %v3153_v21, %v1448_v27  ;;  %v1551_v34 = vadd.f32 %v3153_v21, %v1480_v28 }
 0x177   : > { %v1030_v35 = vpop.f32.mrf.mxu0  ;;  %v1158_v36 = vpop.f32.mrf.mxu1 }
 0x178   : > { %2494 = vst [vmem:[%s3167_s9 + $0x28] sm:$0xff] %v2358_v31   ;;  %2510 = vst [vmem:[%s3167_s9 + $0xa8] sm:$0xff] %v2438_v32   ;;  %v1449_v37 = vmul.f32 %v3147_v17, %v1030_v35  ;;  %v1481_v38 = vmul.f32 %v3147_v17, %v1158_v36  ;;  %v1583_v43 = vmax.f32 %v1519_v33, 0.0  ;;  %v1615_v44 = vmax.f32 %v1551_v34, 0.0 }
 0x179   : > { %v1032_v39 = vpop.f32.mrf.mxu0  ;;  %v1160_v40 = vpop.f32.mrf.mxu1 }
 0x17a   : > { %v1520_v41 = vadd.f32 %v3153_v21, %v1449_v37  ;;  %v1552_v42 = vadd.f32 %v3153_v21, %v1481_v38 }
 0x17b   : > { %v1035_v45 = vpop.f32.mrf.mxu0  ;;  %v1163_v46 = vpop.f32.mrf.mxu1 }
 0x17c   : > { %v1584_v47 = vmax.f32 %v1520_v41, 0.0  ;;  %v1616_v48 = vmax.f32 %v1552_v42, 0.0  ;;  %v1450_v49 = vmul.f32 %v3147_v17, %v1035_v45  ;;  %v1482_v50 = vmul.f32 %v3147_v17, %v1163_v46 }
 0x17d   : > { %v1037_v51 = vpop.f32.mrf.mxu0  ;;  %v1165_v52 = vpop.f32.mrf.mxu1 }
 0x17e   : > { %v2363_v53 = vpack.c.bf16 %v1584_v47, %v1583_v43  ;;  %v2443_v54 = vpack.c.bf16 %v1616_v48, %v1615_v44  ;;  %v1521_v55 = vadd.f32 %v3153_v21, %v1450_v49  ;;  %v1553_v56 = vadd.f32 %v3153_v21, %v1482_v50 }
 0x17f   : > { %v1038_v57 = vpop.f32.mrf.mxu0  ;;  %v1166_v58 = vpop.f32.mrf.mxu1 }
 0x180   : > { %2495 = vst [vmem:[%s3167_s9 + $0x30] sm:$0xff] %v2363_v53   ;;  %2511 = vst [vmem:[%s3167_s9 + $0xb0] sm:$0xff] %v2443_v54   ;;  %v1451_v59 = vmul.f32 %v3147_v17, %v1038_v57  ;;  %v1483_v60 = vmul.f32 %v3147_v17, %v1166_v58  ;;  %v1585_v1 = vmax.f32 %v1521_v55, 0.0  ;;  %v1617_v2 = vmax.f32 %v1553_v56, 0.0 }
 0x181   : > { %v1040_v61 = vpop.f32.mrf.mxu0  ;;  %v1168_v62 = vpop.f32.mrf.mxu1 }
 0x182   : > { %v1522_v63 = vadd.f32 %v3153_v21, %v1451_v59  ;;  %v1554_v0 = vadd.f32 %v3153_v21, %v1483_v60 }
 0x183   : > { %v1043_v3 = vpop.f32.mrf.mxu0  ;;  %v1171_v4 = vpop.f32.mrf.mxu1 }
 0x184   : > { %v1586_v5 = vmax.f32 %v1522_v63, 0.0  ;;  %v1618_v6 = vmax.f32 %v1554_v0, 0.0  ;;  %v1452_v7 = vmul.f32 %v3147_v17, %v1043_v3  ;;  %v1484_v8 = vmul.f32 %v3147_v17, %v1171_v4 }
 0x185   : > { %v1045_v9 = vpop.f32.mrf.mxu0  ;;  %v1173_v10 = vpop.f32.mrf.mxu1 }
 0x186   : > { %v2368_v11 = vpack.c.bf16 %v1586_v5, %v1585_v1  ;;  %v2448_v12 = vpack.c.bf16 %v1618_v6, %v1617_v2  ;;  %v1523_v13 = vadd.f32 %v3153_v21, %v1452_v7  ;;  %v1555_v14 = vadd.f32 %v3153_v21, %v1484_v8 }
 0x187   : > { %v1046_v15 = vpop.f32.mrf.mxu0  ;;  %v1174_v16 = vpop.f32.mrf.mxu1 }
 0x188   : > { %2496 = vst [vmem:[%s3167_s9 + $0x38] sm:$0xff] %v2368_v11   ;;  %2512 = vst [vmem:[%s3167_s9 + $0xb8] sm:$0xff] %v2448_v12   ;;  %v1453_v18 = vmul.f32 %v3147_v17, %v1046_v15  ;;  %v1485_v19 = vmul.f32 %v3147_v17, %v1174_v16  ;;  %v1587_v25 = vmax.f32 %v1523_v13, 0.0  ;;  %v1619_v26 = vmax.f32 %v1555_v14, 0.0 }
 0x189   : > { %v1048_v20 = vpop.f32.mrf.mxu0  ;;  %v1176_v22 = vpop.f32.mrf.mxu1 }
 0x18a   : > { %v1524_v23 = vadd.f32 %v3153_v21, %v1453_v18  ;;  %v1556_v24 = vadd.f32 %v3153_v21, %v1485_v19 }
 0x18b   : > { %v1051_v27 = vpop.f32.mrf.mxu0  ;;  %v1179_v28 = vpop.f32.mrf.mxu1 }
 0x18c   : > { %v1588_v29 = vmax.f32 %v1524_v23, 0.0  ;;  %v1620_v30 = vmax.f32 %v1556_v24, 0.0  ;;  %v1454_v31 = vmul.f32 %v3147_v17, %v1051_v27  ;;  %v1486_v32 = vmul.f32 %v3147_v17, %v1179_v28 }
 0x18d   : > { %v1053_v33 = vpop.f32.mrf.mxu0  ;;  %v1181_v34 = vpop.f32.mrf.mxu1 }
 0x18e   : > { %v2373_v35 = vpack.c.bf16 %v1588_v29, %v1587_v25  ;;  %v2453_v36 = vpack.c.bf16 %v1620_v30, %v1619_v26  ;;  %v1525_v37 = vadd.f32 %v3153_v21, %v1454_v31  ;;  %v1557_v38 = vadd.f32 %v3153_v21, %v1486_v32 }
 0x18f   : > { %v1054_v39 = vpop.f32.mrf.mxu0  ;;  %v1182_v40 = vpop.f32.mrf.mxu1 }
 0x190   : > { %2497 = vst [vmem:[%s3167_s9 + $0x40] sm:$0xff] %v2373_v35   ;;  %2513 = vst [vmem:[%s3167_s9 + $0xc0] sm:$0xff] %v2453_v36   ;;  %v1455_v41 = vmul.f32 %v3147_v17, %v1054_v39  ;;  %v1487_v42 = vmul.f32 %v3147_v17, %v1182_v40  ;;  %v1589_v47 = vmax.f32 %v1525_v37, 0.0  ;;  %v1621_v48 = vmax.f32 %v1557_v38, 0.0 }
 0x191   : > { %v1056_v43 = vpop.f32.mrf.mxu0  ;;  %v1184_v44 = vpop.f32.mrf.mxu1 }
 0x192   : > { %v1526_v45 = vadd.f32 %v3153_v21, %v1455_v41  ;;  %v1558_v46 = vadd.f32 %v3153_v21, %v1487_v42 }
 0x193   : > { %v1059_v49 = vpop.f32.mrf.mxu0  ;;  %v1187_v50 = vpop.f32.mrf.mxu1 }
 0x194   : > { %v1590_v51 = vmax.f32 %v1526_v45, 0.0  ;;  %v1622_v52 = vmax.f32 %v1558_v46, 0.0  ;;  %v1456_v53 = vmul.f32 %v3147_v17, %v1059_v49  ;;  %v1488_v54 = vmul.f32 %v3147_v17, %v1187_v50 }
 0x195   : > { %v1061_v55 = vpop.f32.mrf.mxu0  ;;  %v1189_v56 = vpop.f32.mrf.mxu1 }
 0x196   : > { %v2378_v57 = vpack.c.bf16 %v1590_v51, %v1589_v47  ;;  %v2458_v58 = vpack.c.bf16 %v1622_v52, %v1621_v48  ;;  %v1527_v59 = vadd.f32 %v3153_v21, %v1456_v53  ;;  %v1559_v60 = vadd.f32 %v3153_v21, %v1488_v54 }
 0x197   : > { %v1062_v61 = vpop.f32.mrf.mxu0  ;;  %v1190_v62 = vpop.f32.mrf.mxu1 }
 0x198   : > { %2498 = vst [vmem:[%s3167_s9 + $0x48] sm:$0xff] %v2378_v57   ;;  %2514 = vst [vmem:[%s3167_s9 + $0xc8] sm:$0xff] %v2458_v58   ;;  %v1457_v63 = vmul.f32 %v3147_v17, %v1062_v61  ;;  %v1489_v0 = vmul.f32 %v3147_v17, %v1190_v62  ;;  %v1591_v5 = vmax.f32 %v1527_v59, 0.0  ;;  %v1623_v6 = vmax.f32 %v1559_v60, 0.0 }
 0x199   : > { %v1064_v1 = vpop.f32.mrf.mxu0  ;;  %v1192_v2 = vpop.f32.mrf.mxu1 }
 0x19a   : > { %v1528_v3 = vadd.f32 %v3153_v21, %v1457_v63  ;;  %v1560_v4 = vadd.f32 %v3153_v21, %v1489_v0 }
 0x19b   : > { %v1067_v7 = vpop.f32.mrf.mxu0  ;;  %v1195_v8 = vpop.f32.mrf.mxu1 }
 0x19c   : > { %v1592_v9 = vmax.f32 %v1528_v3, 0.0  ;;  %v1624_v10 = vmax.f32 %v1560_v4, 0.0  ;;  %v1458_v11 = vmul.f32 %v3147_v17, %v1067_v7  ;;  %v1490_v12 = vmul.f32 %v3147_v17, %v1195_v8 }
 0x19d   : > { %v1069_v13 = vpop.f32.mrf.mxu0  ;;  %v1197_v14 = vpop.f32.mrf.mxu1 }
 0x19e   : > { %v2383_v15 = vpack.c.bf16 %v1592_v9, %v1591_v5  ;;  %v2463_v16 = vpack.c.bf16 %v1624_v10, %v1623_v6  ;;  %v1529_v18 = vadd.f32 %v3153_v21, %v1458_v11  ;;  %v1561_v19 = vadd.f32 %v3153_v21, %v1490_v12 }
 0x19f   : > { %v1070_v20 = vpop.f32.mrf.mxu0  ;;  %v1198_v22 = vpop.f32.mrf.mxu1 }
 0x1a0   : > { %2499 = vst [vmem:[%s3167_s9 + $0x50] sm:$0xff] %v2383_v15   ;;  %2515 = vst [vmem:[%s3167_s9 + $0xd0] sm:$0xff] %v2463_v16   ;;  %v1459_v23 = vmul.f32 %v3147_v17, %v1070_v20  ;;  %v1491_v24 = vmul.f32 %v3147_v17, %v1198_v22  ;;  %v1593_v29 = vmax.f32 %v1529_v18, 0.0  ;;  %v1625_v30 = vmax.f32 %v1561_v19, 0.0 }
 0x1a1   : > { %v1072_v25 = vpop.f32.mrf.mxu0  ;;  %v1200_v26 = vpop.f32.mrf.mxu1 }
 0x1a2   : > { %v1530_v27 = vadd.f32 %v3153_v21, %v1459_v23  ;;  %v1562_v28 = vadd.f32 %v3153_v21, %v1491_v24 }
 0x1a3   : > { %v1075_v31 = vpop.f32.mrf.mxu0  ;;  %v1203_v32 = vpop.f32.mrf.mxu1 }
 0x1a4   : > { %v1594_v33 = vmax.f32 %v1530_v27, 0.0  ;;  %v1626_v34 = vmax.f32 %v1562_v28, 0.0  ;;  %v1460_v35 = vmul.f32 %v3147_v17, %v1075_v31  ;;  %v1492_v36 = vmul.f32 %v3147_v17, %v1203_v32 }
 0x1a5   : > { %v1077_v37 = vpop.f32.mrf.mxu0  ;;  %v1205_v38 = vpop.f32.mrf.mxu1 }
 0x1a6   : > { %v2388_v39 = vpack.c.bf16 %v1594_v33, %v1593_v29  ;;  %v2468_v40 = vpack.c.bf16 %v1626_v34, %v1625_v30  ;;  %v1531_v41 = vadd.f32 %v3153_v21, %v1460_v35  ;;  %v1563_v42 = vadd.f32 %v3153_v21, %v1492_v36 }
 0x1a7   : > { %v1078_v43 = vpop.f32.mrf.mxu0  ;;  %v1206_v44 = vpop.f32.mrf.mxu1 }
 0x1a8   : > { %2500 = vst [vmem:[%s3167_s9 + $0x58] sm:$0xff] %v2388_v39   ;;  %2516 = vst [vmem:[%s3167_s9 + $0xd8] sm:$0xff] %v2468_v40   ;;  %v1461_v45 = vmul.f32 %v3147_v17, %v1078_v43  ;;  %v1493_v46 = vmul.f32 %v3147_v17, %v1206_v44  ;;  %v1595_v51 = vmax.f32 %v1531_v41, 0.0  ;;  %v1627_v52 = vmax.f32 %v1563_v42, 0.0 }
 0x1a9   : > { %v1080_v47 = vpop.f32.mrf.mxu0  ;;  %v1208_v48 = vpop.f32.mrf.mxu1 }
 0x1aa   : > { %v1532_v49 = vadd.f32 %v3153_v21, %v1461_v45  ;;  %v1564_v50 = vadd.f32 %v3153_v21, %v1493_v46 }
 0x1ab   : > { %v1083_v53 = vpop.f32.mrf.mxu0  ;;  %v1211_v54 = vpop.f32.mrf.mxu1 }
 0x1ac   : > { %v1596_v55 = vmax.f32 %v1532_v49, 0.0  ;;  %v1628_v56 = vmax.f32 %v1564_v50, 0.0  ;;  %v1462_v57 = vmul.f32 %v3147_v17, %v1083_v53  ;;  %v1494_v58 = vmul.f32 %v3147_v17, %v1211_v54 }
 0x1ad   : > { %v1085_v59 = vpop.f32.mrf.mxu0  ;;  %v1213_v60 = vpop.f32.mrf.mxu1 }
 0x1ae   : > { %v2393_v61 = vpack.c.bf16 %v1596_v55, %v1595_v51  ;;  %v2473_v62 = vpack.c.bf16 %v1628_v56, %v1627_v52  ;;  %v1533_v63 = vadd.f32 %v3153_v21, %v1462_v57  ;;  %v1565_v0 = vadd.f32 %v3153_v21, %v1494_v58 }
 0x1af   : > { %v1086_v1 = vpop.f32.mrf.mxu0  ;;  %v1214_v2 = vpop.f32.mrf.mxu1 }
 0x1b0   : > { %2501 = vst [vmem:[%s3167_s9 + $0x60] sm:$0xff] %v2393_v61   ;;  %2517 = vst [vmem:[%s3167_s9 + $0xe0] sm:$0xff] %v2473_v62   ;;  %v1463_v3 = vmul.f32 %v3147_v17, %v1086_v1  ;;  %v1495_v4 = vmul.f32 %v3147_v17, %v1214_v2  ;;  %v1597_v9 = vmax.f32 %v1533_v63, 0.0  ;;  %v1629_v10 = vmax.f32 %v1565_v0, 0.0 }
 0x1b1   : > { %v1088_v5 = vpop.f32.mrf.mxu0  ;;  %v1216_v6 = vpop.f32.mrf.mxu1 }
 0x1b2   : > { %v1534_v7 = vadd.f32 %v3153_v21, %v1463_v3  ;;  %v1566_v8 = vadd.f32 %v3153_v21, %v1495_v4 }
 0x1b3   : > { %v1091_v11 = vpop.f32.mrf.mxu0  ;;  %v1219_v12 = vpop.f32.mrf.mxu1 }
 0x1b4   : > { %v1598_v13 = vmax.f32 %v1534_v7, 0.0  ;;  %v1630_v14 = vmax.f32 %v1566_v8, 0.0  ;;  %v1464_v15 = vmul.f32 %v3147_v17, %v1091_v11  ;;  %v1496_v16 = vmul.f32 %v3147_v17, %v1219_v12 }
 0x1b5   : > { %v1093_v18 = vpop.f32.mrf.mxu0  ;;  %v1221_v19 = vpop.f32.mrf.mxu1 }
 0x1b6   : > { %v2398_v20 = vpack.c.bf16 %v1598_v13, %v1597_v9  ;;  %v2478_v22 = vpack.c.bf16 %v1630_v14, %v1629_v10  ;;  %v1535_v23 = vadd.f32 %v3153_v21, %v1464_v15  ;;  %v1567_v24 = vadd.f32 %v3153_v21, %v1496_v16 }
 0x1b7   : > { %v1094_v25 = vpop.f32.mrf.mxu0  ;;  %v1222_v26 = vpop.f32.mrf.mxu1 }
 0x1b8   : > { %2502 = vst [vmem:[%s3167_s9 + $0x68] sm:$0xff] %v2398_v20   ;;  %2518 = vst [vmem:[%s3167_s9 + $0xe8] sm:$0xff] %v2478_v22   ;;  %v1465_v27 = vmul.f32 %v3147_v17, %v1094_v25  ;;  %v1497_v28 = vmul.f32 %v3147_v17, %v1222_v26  ;;  %v1599_v33 = vmax.f32 %v1535_v23, 0.0  ;;  %v1631_v34 = vmax.f32 %v1567_v24, 0.0 }
 0x1b9   : > { %v1096_v29 = vpop.f32.mrf.mxu0  ;;  %v1224_v30 = vpop.f32.mrf.mxu1 }
 0x1ba   : > { %v1536_v31 = vadd.f32 %v3153_v21, %v1465_v27  ;;  %v1568_v32 = vadd.f32 %v3153_v21, %v1497_v28 }
 0x1bb   : > { %v1099_v35 = vpop.f32.mrf.mxu0  ;;  %v1227_v36 = vpop.f32.mrf.mxu1 }
 0x1bc   : > { %v1600_v37 = vmax.f32 %v1536_v31, 0.0  ;;  %v1632_v38 = vmax.f32 %v1568_v32, 0.0  ;;  %v1466_v39 = vmul.f32 %v3147_v17, %v1099_v35  ;;  %v1498_v40 = vmul.f32 %v3147_v17, %v1227_v36 }
 0x1bd   : > { %v1101_v41 = vpop.f32.mrf.mxu0  ;;  %v1229_v42 = vpop.f32.mrf.mxu1 }
 0x1be   : > { %v2403_v43 = vpack.c.bf16 %v1600_v37, %v1599_v33  ;;  %v2483_v44 = vpack.c.bf16 %v1632_v38, %v1631_v34  ;;  %v1537_v47 = vadd.f32 %v3153_v21, %v1466_v39  ;;  %v1569_v48 = vadd.f32 %v3153_v21, %v1498_v40 }
 0x1bf   : > { %v1102_v45 = vpop.f32.mrf.mxu0  ;;  %v1230_v46 = vpop.f32.mrf.mxu1 }
 0x1c0   : > { %2503 = vst [vmem:[%s3167_s9 + $0x70] sm:$0xff] %v2403_v43   ;;  %2519 = vst [vmem:[%s3167_s9 + $0xf0] sm:$0xff] %v2483_v44   ;;  %v1467_v49 = vmul.f32 %v3147_v17, %v1102_v45  ;;  %v1499_v50 = vmul.f32 %v3147_v17, %v1230_v46  ;;  %v1601_v55 = vmax.f32 %v1537_v47, 0.0  ;;  %v1633_v56 = vmax.f32 %v1569_v48, 0.0 }
 0x1c1   : > { %v1104_v51 = vpop.f32.mrf.mxu0  ;;  %v1232_v52 = vpop.f32.mrf.mxu1 }
 0x1c2   : > { %v1538_v53 = vadd.f32 %v3153_v21, %v1467_v49  ;;  %v1570_v54 = vadd.f32 %v3153_v21, %v1499_v50 }
 0x1c4   : > { %v1602_v57 = vmax.f32 %v1538_v53, 0.0  ;;  %v1634_v58 = vmax.f32 %v1570_v54, 0.0 }
 0x1c6   : > { %v2408_v17 = vpack.c.bf16 %v1602_v57, %v1601_v55  ;;  %v2488_v59 = vpack.c.bf16 %v1634_v58, %v1633_v56 }
 0x1c8   : > { %2504 = vst [vmem:[%s3167_s9 + $0x78] sm:$0xff] %v2408_v17   ;;  %2520 = vst [vmem:[%s3167_s9 + $0xf8] sm:$0xff] %v2488_v59  }
 0x1c9   : > { %2812 = shalt.err (!%p2809_p3)
}
 0x1ca   : > { %s2813_s6 = scalar_lea.hbm %s3320_s29, 4096  ;;  %s2817_s27 = scalar_lea.hbm %s3375_s4, 16384 }
 0x1cb   : > { %p2814_p5 = scmp.ne.s32.totalorder %s3320_s29, %s2813_s6  ;;  %p2818_p6 = scmp.lt.s32.totalorder %s3320_s29, %s3375_s4 }
 0x1cc   : > { %p2819_p11 = scmp.lt.s32.totalorder %s2817_s27, %s2813_s6 }
 0x1cd   : > { %p2815_p7 = pnand %p2814_p5, %p3388_p4 }
 0x1ce   : > { %p2820_p10 = por %p2819_p11, %p2818_p6 }
 0x1cf   : > { %p2816_p9 = pneg %p2815_p7 }
 0x1d1   : > { %p2821_p1 = pnand %p2820_p10, %p2816_p9 }
 0x1d3   : > { %2824 = shalt.err (!%p2821_p1)
}
 0x1d4   : > { %s2893_s9 = smov 64   ;;  %s2894_s24 = smov 4  }
 0x1d5   : > { %2559 = dma.vmem_to_hbm [thread:$0]  (%p3388_p4), %s3322_s10, 4096, %s3320_s29, %s1956_s18, %s2893_s9, %s2893_s9, %s2894_s24  }
 0x1d6 PF: > { %p2576_p8 = scmp.ge.s32.totalorder %s2883_s20, 2  ;;  %s1985_s14 = sand.u32 1, %s2863_s15  }
 0x1d7   : > { %p3389_p12 = scmp.ne.s32.totalorder %s3381_s26, 0  ;;  %s1986_s11 = scalar_lea.sflag [#allocation5], %s1985_s14 }
 0x1d9   : > { %p2570_p13 = pnand %p2576_p8, %p3389_p12 }
 0x1db   : > { %p2571_p0 = pneg %p2570_p13 }
 0x1dd   : > { %2858 = dma.done.wait (%p2571_p0), %s1986_s11, 4096  }
 0x1de   : > { %2860 = vsyncadd (%p2571_p0), %s1986_s11, 4294963200  ;;  %s21_s20 = sadd.s32 1, %s2883_s20   ;;  %s3390_s15 = smov %s2867_s16 }
 0x1df   : > { %p18_p2 = scmp.ge.s32.totalorder %s21_s20, 6   ;;  %s3391_s16 = smov %s2871_s17 }
 0x1e0   : > { %s3392_s17 = smov %s3015_s28  ;;  %s3393_s18 = smov %s2879_s19 }
 0x1e1   : > { %s3394_s19 = smov %s3396_s5  ;;  %20 = sbr.rel (!%p18_p2) target bundleno = 9 (0x9), region = 100 }
 0x1e6   :  { %1991 = vsyncpa [#allocation4], 1 }
 0x1e7   :  { %1993 = vsyncpa [#allocation4 + $0x1], 1 }
 0x1e8   :  { %1994 = vsyncpa [#allocation7], 1 }
 0x1e9   :  { %1995 = vsyncpa [#allocation5], 1 }
 0x1ea   :  { %1997 = vsyncpa [#allocation5 + $0x1], 1 }

</bundles_post_ra>
